<compile_context>
chip_gen: v5e
topology: v5e:2x2
jax: 0.10.0
libtpu: 0.0.40
codegen_flags: <defaults>
</compile_context>

<pallas_src>
import functools

import jax
import jax.numpy as jnp
from jax.experimental import pallas as pl
from jax.experimental.pallas import tpu as pltpu


def _conv_block_kernel(x_ref, w_ref, b_ref, o_ref, *, activation):
    # x_ref: (B*Ho, KH*Wp*Cin)   im2col-style lane-packed rows
    # w_ref: (KH*Wp*Cin, Wo*Cout) flattened banded weights
    # b_ref: (1, Wo*Cout)        bias tiled along Wo
    # o_ref: (B*Ho, Wo*Cout)     lane-dense output tile
    acc = jnp.dot(x_ref[...], w_ref[...], preferred_element_type=jnp.float32)
    acc = acc + b_ref[...]                        # f32 bias add (broadcast over M)
    if activation:
        acc = jnp.maximum(acc, 0.0)               # ReLU in f32
    o_ref[...] = acc.astype(o_ref.dtype)


def _expand_weight_band(weight, Wo, Wp):
    """(Cout, Cin, KH, KW) -> banded (KH, Wp*Cin, Wo*Cout) matmul weights.

    w_band[kh, (wo+kw)*Cin + cin, wo*Cout + cout] = weight[cout, cin, kh, kw]
    """
    Cout, Cin, KH, KW = weight.shape
    w_hwio = jnp.transpose(weight, (2, 3, 1, 0))           # (KH, KW, Cin, Cout)
    eye = jnp.eye(Wo, dtype=weight.dtype)
    bands = []
    for kh in range(KH):
        acc = jnp.zeros((Wp * Cin, Wo * Cout), dtype=weight.dtype)
        for kw in range(KW):
            blockdiag = jnp.kron(eye, w_hwio[kh, kw])      # (Wo*Cin, Wo*Cout)
            acc = acc + jnp.pad(
                blockdiag, ((kw * Cin, (Wp - Wo - kw) * Cin), (0, 0)))
        bands.append(acc)
    return jnp.stack(bands, axis=0)                        # (KH, Wp*Cin, Wo*Cout)


def prepare_conv_block_params(weight, bias, *, H, W, stride=1, padding=None):
    """Once-per-weight preparation (hoisted out of the forward path)."""
    del H  # weight expansion only depends on the W extent
    assert stride == 1, "only stride=1 implemented"
    Cout, Cin, KH, KW = weight.shape
    pad_w = KW // 2 if padding is None else padding
    Wp = W + 2 * pad_w
    Wo = Wp - KW + 1                                       # stride 1
    w_band = _expand_weight_band(weight, Wo, Wp)           # (KH, Wp*Cin, Wo*Cout)
    w_flat = w_band.reshape(KH * Wp * Cin, Wo * Cout)      # (KH*Wp*Cin, Wo*Cout)
    b_tiled = jnp.tile(bias, Wo).reshape(1, Wo * Cout)     # (1, Wo*Cout)
    return w_flat, b_tiled


def conv_block_apply(x_nchw, w_flat, b_tiled, *, kernel_size, stride=1,
                     padding=None, activation=True):
    """Forward pass of ConvBlock using precomputed (w_flat, b_tiled)."""
    assert stride == 1, "only stride=1 implemented"
    B, Cin, H, W = x_nchw.shape
    KH = KW = kernel_size
    pad = kernel_size // 2 if padding is None else padding
    Hp, Wp = H + 2 * pad, W + 2 * pad
    Ho, Wo = Hp - KH + 1, Wp - KW + 1                      # stride 1
    N = b_tiled.shape[-1]
    Cout = N // Wo
    assert w_flat.shape == (KH * Wp * Cin, Wo * Cout), w_flat.shape

    # ---- glue (plain JAX): layout change, zero padding, im2col row-bands ----
    x_nhwc = jnp.transpose(x_nchw, (0, 2, 3, 1))                       # (B,H,W,Cin)
    x_pad = jnp.pad(x_nhwc, ((0, 0), (pad, pad), (pad, pad), (0, 0)))
    x_flat = x_pad.reshape(B, Hp, Wp * Cin)                            # lane-packed
    # Stack the KH shifted row-bands along the lane/K axis, fold batch into M.
    x_bands = jnp.concatenate(
        [x_flat[:, kh:kh + Ho, :] for kh in range(KH)], axis=-1)       # (B,Ho,KH*Wp*Cin)
    x_im = x_bands.reshape(B * Ho, KH * Wp * Cin)                      # (B*Ho, K)

    kernel = functools.partial(_conv_block_kernel, activation=activation)
    out = pl.pallas_call(
        kernel,
        out_shape=jax.ShapeDtypeStruct((B * Ho, Wo * Cout), x_nchw.dtype),
        in_specs=[
            pl.BlockSpec(memory_space=pltpu.MemorySpace.VMEM),
            pl.BlockSpec(memory_space=pltpu.MemorySpace.VMEM),
            pl.BlockSpec(memory_space=pltpu.MemorySpace.VMEM),
        ],
        out_specs=pl.BlockSpec(memory_space=pltpu.MemorySpace.VMEM),
    )(x_im, w_flat, b_tiled)

    out = out.reshape(B, Ho, Wo, Cout)                                 # unfold lanes
    return jnp.transpose(out, (0, 3, 1, 2))                            # back to NCHW


def conv_block(x_nchw, weight, bias, *, stride=1, padding=None, activation=True):
    """Convenience one-shot path (prepare + apply)."""
    B, Cin, H, W = x_nchw.shape
    w_flat, b_tiled = prepare_conv_block_params(
        weight, bias, H=H, W=W, stride=stride, padding=padding)
    return conv_block_apply(x_nchw, w_flat, b_tiled,
                            kernel_size=weight.shape[-1], stride=stride,
                            padding=padding, activation=activation)


def _reference(x_nchw, weight, bias, *, padding, activation=True):
    out = jax.lax.conv_general_dilated(
        x_nchw, weight, window_strides=(1, 1),
        padding=[(padding, padding), (padding, padding)],
        dimension_numbers=("NCHW", "OIHW", "NCHW"))
    out = out + bias.reshape(1, -1, 1, 1)
    if activation:
        out = jnp.maximum(out, 0.0)
    return out


if __name__ == "__main__":
    # Small ConvBlock: in_channels=4, out_channels=8, kernel_size=3,
    # stride=1, padding=kernel_size//2=1, groups=1, activation=True.
    B, Cin, H, W = 2, 4, 16, 16
    Cout, K = 8, 3

    key = jax.random.PRNGKey(0)
    kx, kw, kb = jax.random.split(key, 3)
    x = jax.random.normal(kx, (B, Cin, H, W), dtype=jnp.float32)
    weight = jax.random.normal(kw, (Cout, Cin, K, K), dtype=jnp.float32) * 0.1
    bias = jax.random.normal(kb, (Cout,), dtype=jnp.float32) * 0.1

    # Once-per-weight preparation, hoisted out of the forward path.
    w_flat, b_tiled = jax.block_until_ready(
        prepare_conv_block_params(weight, bias, H=H, W=W))

    fwd = jax.jit(functools.partial(
        conv_block_apply, kernel_size=K, stride=1, padding=None, activation=True))
    out = jax.block_until_ready(fwd(x, w_flat, b_tiled))

    ref = _reference(x, weight, bias, padding=K // 2, activation=True)
    assert out.shape == (B, Cout, H, W), out.shape
    assert jnp.allclose(out, ref, atol=1e-4, rtol=1e-4), "mismatch vs reference"

    print("KERNEL_OK")
</pallas_src>

<mosaic_0001>
module attributes {stable_mosaic.version = 11 : i64} {
  func.func @_conv_block_kernel(%arg0: memref<32x216xf32, #tpu.memory_space<vmem>>, %arg1: memref<216x128xf32, #tpu.memory_space<vmem>>, %arg2: memref<1x128xf32, #tpu.memory_space<vmem>>, %arg3: memref<32x128xf32, #tpu.memory_space<vmem>>) attributes {dimension_semantics = [], scalar_prefetch = 0 : i64, scratch_operands = 0 : i64, tpu.core_type = #tpu.core_type<tc>} {
    %c0 = arith.constant 0 : index
    %c0_0 = arith.constant 0 : index
    %0 = vector.load %arg0[%c0, %c0_0] : memref<32x216xf32, #tpu.memory_space<vmem>>, vector<32x216xf32>
    %c0_1 = arith.constant 0 : index
    %c0_2 = arith.constant 0 : index
    %1 = vector.load %arg1[%c0_1, %c0_2] : memref<216x128xf32, #tpu.memory_space<vmem>>, vector<216x128xf32>
    %cst = arith.constant dense<0.000000e+00> : vector<32x128xf32>
    %2 = tpu.matmul %0, %1, %cst {dimension_numbers = #tpu.dot_dimension_numbers<[1], [0], [0], [1], [0, 0, 1, 1], [], []>} : vector<32x216xf32>, vector<216x128xf32>, vector<32x128xf32> -> vector<32x128xf32>
    %c0_3 = arith.constant 0 : index
    %c0_4 = arith.constant 0 : index
    %3 = vector.load %arg2[%c0_3, %c0_4] : memref<1x128xf32, #tpu.memory_space<vmem>>, vector<1x128xf32>
    %4 = vector.broadcast %3 : vector<1x128xf32> to vector<32x128xf32>
    %5 = arith.addf %2, %4 : vector<32x128xf32>
    %cst_5 = arith.constant 0.000000e+00 : f32
    %6 = vector.broadcast %cst_5 : f32 to vector<32x128xf32>
    %7 = arith.maximumf %5, %6 : vector<32x128xf32>
    %c0_6 = arith.constant 0 : index
    %c0_7 = arith.constant 0 : index
    %8 = vector.load %arg3[%c0_6, %c0_7] : memref<32x128xf32, #tpu.memory_space<vmem>>, vector<32x128xf32>
    tpu.vector_store %arg3[%c0_6, %c0_7], %7 {strides = array<i32>} : memref<32x128xf32, #tpu.memory_space<vmem>>, vector<32x128xf32>,
    return
  }
}

</mosaic_0001>

<bundles_post_ra>
// kernel: conv_block_apply.1
= control target key start
LH: loop header
LB: loop body
LE: loop exit
PB: predicated region body
PF: predicated region fallthrough
CT: control target
= control target key end

     0   :  { %vm53_vm0 = vcmask 719872   ;;  %s317_s1 = inlined_call_operand.vmem [shape: f32[216,128], index: 1, kind: input, shape index: {}]   ;;  %s318_s0 = inlined_call_operand.vmem [shape: f32[32,216], index: 0, kind: input, shape index: {}]   ;;  %s319_s2 = inlined_call_operand.vmem [shape: f32[1,128], index: 2, kind: input, shape index: {}]   ;;  %s320_s3 = inlined_call_operand.vmem [shape: f32[32,128], index: 3, kind: output, shape index: {}]  }
   0x1   :  { %v37_v0 = vld [vmem:[%s317_s1 + $0x78] sm:$0xff]  ;;  %v36_v1 = vld [vmem:[%s317_s1 + $0x70] sm:$0xff]  ;;  %v47_v3 = vld [vmem:[%s317_s1 + $0xc8] sm:$0xff] }
   0x2   :  { %v48_v2 = vld [vmem:[%s317_s1 + $0xd0] sm:$0xff]  ;;  %66 = vmatpush.msra.mxu0 %v37_v0  ;;  %140 = vmatpush.msra.mxu2 %v37_v0  ;;  %v35_v4 = vld [vmem:[%s317_s1 + $0x68] sm:$0xff]  ;;  %v46_v5 = vld [vmem:[%s317_s1 + $0xc0] sm:$0xff] }
   0x3   :  { %141 = vmatpush.msra.mxu3 %v37_v0  ;;  %100 = vmatpush.msra.mxu1 %v48_v2  ;;  %v34_v6 = vld [vmem:[%s317_s1 + $0x60] sm:$0xff]  ;;  %v45_v7 = vld [vmem:[%s317_s1 + $0xb8] sm:$0xff]  ;;  %v44_v9 = vld [vmem:[%s317_s1 + $0xb0] sm:$0xff] }
   0x4   :  { %67 = vmatpush.msra.mxu0 %v36_v1  ;;  %142 = vmatpush.msra.mxu2 %v36_v1  ;;  %v33_v8 = vld [vmem:[%s317_s1 + $0x58] sm:$0xff]  ;;  %v32_v10 = vld [vmem:[%s317_s1 + $0x50] sm:$0xff]  ;;  %v43_v11 = vld [vmem:[%s317_s1 + $0xa8] sm:$0xff] }
   0x5   :  { %143 = vmatpush.msra.mxu3 %v36_v1  ;;  %101 = vmatpush.msra.mxu1 %v47_v3  ;;  %v31_v12 = vld [vmem:[%s317_s1 + $0x48] sm:$0xff]  ;;  %v42_v13 = vld [vmem:[%s317_s1 + $0xa0] sm:$0xff]  ;;  %v41_v15 = vld [vmem:[%s317_s1 + $0x98] sm:$0xff] }
   0x6   :  { %68 = vmatpush.msra.mxu0 %v35_v4  ;;  %144 = vmatpush.msra.mxu2 %v35_v4  ;;  %v30_v14 = vld [vmem:[%s317_s1 + $0x40] sm:$0xff]  ;;  %v29_v16 = vld [vmem:[%s317_s1 + $0x38] sm:$0xff]  ;;  %v40_v17 = vld [vmem:[%s317_s1 + $0x90] sm:$0xff] }
   0x7   :  { %145 = vmatpush.msra.mxu3 %v35_v4  ;;  %102 = vmatpush.msra.mxu1 %v46_v5  ;;  %v28_v18 = vld [vmem:[%s317_s1 + $0x30] sm:$0xff]  ;;  %v39_v19 = vld [vmem:[%s317_s1 + $0x88] sm:$0xff]  ;;  %v38_v21 = vld [vmem:[%s317_s1 + $0x80] sm:$0xff] }
   0x8   :  { %69 = vmatpush.msra.mxu0 %v34_v6  ;;  %146 = vmatpush.msra.mxu2 %v34_v6  ;;  %v27_v20 = vld [vmem:[%s317_s1 + $0x28] sm:$0xff]  ;;  %v26_v22 = vld [vmem:[%s317_s1 + $0x20] sm:$0xff]  ;;  %v25_v24 = vld [vmem:[%s317_s1 + $0x18] sm:$0xff] }
   0x9   :  { %147 = vmatpush.msra.mxu3 %v34_v6  ;;  %103 = vmatpush.msra.mxu1 %v45_v7  ;;  %v15_v23 = vld [vmem:[%s318_s0 + $0x8] sm:$0xff]  ;;  %v24_v25 = vld [vmem:[%s317_s1 + $0x10] sm:$0xff]  ;;  %v22_v27 = vld [vmem:[%s317_s1] sm:$0xff] }
   0xa   :  { %70 = vmatpush.msra.mxu0 %v33_v8  ;;  %148 = vmatpush.msra.mxu2 %v33_v8  ;;  %v23_v26 = vld [vmem:[%s317_s1 + $0x8] sm:$0xff]  ;;  %v14_v28 = vld [vmem:[%s318_s0] sm:$0xff]  ;;  %v16_v29 = vld [vmem:[%s318_s0 + $0x10] sm:$0xff] }
   0xb   :  { %149 = vmatpush.msra.mxu3 %v33_v8  ;;  %104 = vmatpush.msra.mxu1 %v44_v9  ;;  %v18_v30 = vld [vmem:[%s318_s0 + $0x20] sm:$0xff]  ;;  %v17_v31 = vld [vmem:[%s318_s0 + $0x18] sm:$0xff]  ;;  %v20_v32 = vld [vmem:[%s318_s0 + $0x30] sm:$0xff] }
   0xc   :  { %71 = vmatpush.msra.mxu0 %v32_v10  ;;  %150 = vmatpush.msra.mxu2 %v32_v10  ;;  %v19_v33 = vld [vmem:[%s318_s0 + $0x28] sm:$0xff]  ;;  %v21_v34 = vld [vmem:[%s318_s0 + $0x38] sm:$0xff]  ;;  %v172_v36 = vld [vmem:[%s319_s2] ss:$0 sm:$0xff] }
   0xd   :  { %151 = vmatpush.msra.mxu3 %v32_v10  ;;  %105 = vmatpush.msra.mxu1 %v43_v11 }
   0xe   :  { %72 = vmatpush.msra.mxu0 %v31_v12  ;;  %152 = vmatpush.msra.mxu2 %v31_v12 }
   0xf   :  { %153 = vmatpush.msra.mxu3 %v31_v12  ;;  %106 = vmatpush.msra.mxu1 %v42_v13 }
  0x10   :  { %73 = vmatpush.msra.mxu0 %v30_v14  ;;  %154 = vmatpush.msra.mxu2 %v30_v14 }
  0x11   :  { %155 = vmatpush.msra.mxu3 %v30_v14  ;;  %107 = vmatpush.msra.mxu1 %v41_v15 }
  0x12   :  { %74 = vmatpush.msra.mxu0 %v29_v16  ;;  %156 = vmatpush.msra.mxu2 %v29_v16 }
  0x13   :  { %157 = vmatpush.msra.mxu3 %v29_v16  ;;  %108 = vmatpush.msra.mxu1 %v40_v17 }
  0x14   :  { %75 = vmatpush.msra.mxu0 %v28_v18  ;;  %158 = vmatpush.msra.mxu2 %v28_v18 }
  0x15   :  { %159 = vmatpush.msra.mxu3 %v28_v18  ;;  %109 = vmatpush.msra.mxu1 %v39_v19 }
  0x16   :  { %76 = vmatpush.msra.mxu0 %v27_v20  ;;  %160 = vmatpush.msra.mxu2 %v27_v20 }
  0x17   :  { %161 = vmatpush.msra.mxu3 %v27_v20  ;;  %110 = vmatpush.msra.mxu1 %v38_v21 }
  0x18   :  { %77 = vmatpush.msra.mxu0 %v26_v22  ;;  %162 = vmatpush.msra.mxu2 %v26_v22 }
  0x19   :  { %163 = vmatpush.msra.mxu3 %v26_v22  ;;  %136 = vmatmul.msk.f32.vlgmr.msra.gmra.mxu1 %vm53_vm0, %v15_v23 }
  0x1a   :  { %78 = vmatpush.msra.mxu0 %v25_v24  ;;  %164 = vmatpush.msra.mxu2 %v25_v24 }
  0x1b   :  { %165 = vmatpush.msra.mxu3 %v25_v24 }
  0x1c   :  { %79 = vmatpush.msra.mxu0 %v24_v25  ;;  %166 = vmatpush.msra.mxu2 %v24_v25 }
  0x1d   :  { %167 = vmatpush.msra.mxu3 %v24_v25 }
  0x1e   :  { %80 = vmatpush.msra.mxu0 %v23_v26  ;;  %168 = vmatpush.msra.mxu2 %v23_v26 }
  0x1f   :  { %169 = vmatpush.msra.mxu3 %v23_v26 }
  0x20   :  { %81 = vmatpush.msra.mxu0 %v22_v27  ;;  %170 = vmatpush.msra.mxu2 %v22_v27 }
  0x21   :  { %171 = vmatpush.msra.mxu3 %v22_v27  ;;  %82 = vmatmul.f32.vlgmr.msra.gmra.mxu0 %v14_v28 }
  0x22   :  { %85 = vmatmul.f32.vlgmr.msra.gmra.mxu2 %v16_v29  ;;  %88 = vmatmul.f32.vlgmr.msra.gmra.mxu3 %v18_v30 }
  0x23   :  { %137 = vmatmul.msk.f32.gmra.mxu1 %vm53_vm0, %v17_v31 }
  0x2a   :  { %91 = vmatmul.f32.gmra.mxu3 %v20_v32 }
  0x2b   :  { %138 = vmatmul.msk.f32.gmra.mxu1 %vm53_vm0, %v19_v33 }
  0x33   :  { %139 = vmatmul.msk.f32.gmra.mxu1 %vm53_vm0, %v21_v34 }
  0x96   :  { %v112_v35 = vpop.f32.mrf.mxu1 }
  0x9e   :  { %v83_v37 = vpop.f32.mrf.mxu0 }
  0x9f   :  { %v84_v38 = vadd.f32 %v172_v36, %v83_v37 }
  0xa0   :  { %v115_v39 = vpop.f32.mrf.mxu1 }
  0xa1   :  { %v113_v40 = vadd.f32 %v112_v35, %v84_v38 }
  0xa3   :  { %v124_v41 = vmax.f32 %v113_v40, 0.0 }
  0xa5   :  { %128 = vst [vmem:[%s320_s3] sm:$0xff] %v124_v41  ;;  %v86_v42 = vpop.f32.mrf.mxu2  ;;  %v89_v43 = vpop.f32.mrf.mxu3 }
  0xa6   :  { %v87_v44 = vadd.f32 %v172_v36, %v86_v42  ;;  %v90_v45 = vadd.f32 %v172_v36, %v89_v43 }
  0xa8   :  { %v116_v46 = vadd.f32 %v115_v39, %v87_v44  ;;  %v118_v47 = vpop.f32.mrf.mxu1 }
  0xa9   :  { %v119_v48 = vadd.f32 %v118_v47, %v90_v45 }
  0xaa   :  { %v125_v49 = vmax.f32 %v116_v46, 0.0 }
  0xab   :  { %v126_v50 = vmax.f32 %v119_v48, 0.0 }
  0xac   :  { %129 = vst [vmem:[%s320_s3 + $0x8] sm:$0xff] %v125_v49 }
  0xad   :  { %130 = vst [vmem:[%s320_s3 + $0x10] sm:$0xff] %v126_v50  ;;  %v92_v51 = vpop.f32.mrf.mxu3 }
  0xae   :  { %v93_v52 = vadd.f32 %v172_v36, %v92_v51 }
  0xb0   :  { %v121_v53 = vpop.f32.mrf.mxu1 }
  0xb1   :  { %v122_v54 = vadd.f32 %v121_v53, %v93_v52 }
  0xb3   :  { %v127_v55 = vmax.f32 %v122_v54, 0.0 }
  0xb5   :  { %131 = vst [vmem:[%s320_s3 + $0x18] sm:$0xff] %v127_v55 }

</bundles_post_ra>
